<compile_context>
chip_gen: v5e
topology: v5e:2x2
jax: 0.10.0
libtpu: 0.0.40
codegen_flags: <defaults>
</compile_context>

<pallas_src>
import jax
import jax.numpy as jnp
from jax import lax
from jax.experimental import pallas as pl
from jax.experimental.pallas import tpu as pltpu

LANES = 128
ACC_ROWS = 32   # accumulator height: 4 f32 vregs => 4 independent VPU add chains


def _cdiv(a, b):
    return -(-a // b)


def _tensorcores_per_device():
    """2 for 2-TensorCore chips (v4 / v5p / v7x), 1 for v5e / v6e (and default)."""
    try:
        kind = jax.devices()[0].device_kind.lower()
    except Exception:
        return 1
    if "lite" in kind or "v5e" in kind or "v6e" in kind or "v6" in kind:
        return 1
    if "v7" in kind or "v4" in kind or "v5p" in kind or "v5" in kind:
        return 2
    return 1


def _vmem_capacity_bytes():
    try:
        return int(pltpu.get_tpu_info().vmem_capacity_bytes)
    except Exception:
        return 64 << 20  # conservative (v7x-sized) fallback


def _make_mse_kernel(tile_rows, steps, arr_rows, needs_mask):
    folds = tile_rows // ACC_ROWS

    def kernel(img_ref, content_ref, partial_ref):
        i = pl.program_id(1)  # inner reduction axis

        @pl.when(i == 0)
        def _():
            partial_ref[...] = jnp.zeros_like(partial_ref)

        diff = img_ref[...].astype(jnp.float32) - content_ref[...].astype(jnp.float32)
        sq = diff * diff
        if needs_mask:
            # Zero contributions from rows past the logical end of the slab
            # (partial last block / clamped duplicate blocks).  The (tile_rows, 1)
            # column iota keeps the mask tiny; broadcast happens in the where.
            row0 = (pl.program_id(0) * steps + i) * tile_rows
            local = lax.broadcasted_iota(jnp.int32, (tile_rows, 1), 0)
            sq = jnp.where(row0 + local < arr_rows, sq, 0.0)
        # Fold (tile_rows, 128) -> (ACC_ROWS, 128) with elementwise VPU adds;
        # no cross-lane/XLU work, no loop-carried scalar dependence.
        partial_ref[...] += jnp.sum(sq.reshape(folds, ACC_ROWS, LANES), axis=0)

    return kernel


def content_loss(img, content):
    """Returns (img, loss) — mirrors ContentLoss.forward storing self.loss."""
    assert img.shape == content.shape, "img and content must match shapes"
    n_elems = img.size
    assert n_elems > 0

    itemsize = min(jnp.dtype(img.dtype).itemsize, jnp.dtype(content.dtype).itemsize)
    rows = _cdiv(n_elems, LANES)

    # Generation-aware tiling: v5e/v6e have 128 MiB VMEM, v7x has 64 MiB.
    vmem_cap = _vmem_capacity_bytes()
    big_vmem = vmem_cap >= (128 << 20)
    row_cap = 16384 if big_vmem else 12288          # cap in-kernel f32 upcast footprint
    target_rows = min((4 << 20) // (LANES * max(itemsize, 1)), row_cap)
    target_rows = max(ACC_ROWS, (target_rows // ACC_ROWS) * ACC_ROWS)
    vmem_limit = (64 << 20) if big_vmem else (44 << 20)

    # 2-way "parallel" split only on 2-TC chips (both cores pull HBM bandwidth);
    # single-TC v5e/v6e keep 1 split => no extra round-up / tail work.
    num_splits = 2 if (_tensorcores_per_device() >= 2 and rows >= 4 * ACC_ROWS) else 1
    rows_per_split = _cdiv(rows, num_splits)
    if rows_per_split >= target_rows:
        tile_rows = target_rows
    else:
        tile_rows = max(ACC_ROWS, (rows_per_split // ACC_ROWS) * ACC_ROWS)
    steps = _cdiv(rows_per_split, tile_rows)

    # Minimal padding only when unavoidable: n % 128 != 0 (fill the last lane
    # row) or a tiny input (< one 32-row tile).  The common 128-divisible case
    # is a pure reshape: zero extra HBM traffic.  Padded zeros are identical on
    # both inputs -> diff == 0; divide stays by the true n_elems.
    arr_rows = max(rows, tile_rows)
    n_arr = arr_rows * LANES

    def to2d(x):
        flat = x.reshape(-1)
        if n_arr != n_elems:
            flat = jnp.pad(flat, (0, n_arr - n_elems))
        return flat.reshape(arr_rows, LANES)

    img2d = to2d(img)
    content2d = to2d(content)

    total_blocks = _cdiv(arr_rows, tile_rows)
    needs_mask = (num_splits * steps * tile_rows) != arr_rows

    if needs_mask:
        # Clamp so no block starts past the end of the slab; the in-kernel row
        # mask (computed from the *unclamped* grid position) zeroes duplicates.
        def in_map(s, i):
            return (jnp.minimum(s * steps + i, total_blocks - 1), 0)
    else:
        def in_map(s, i):
            return (s * steps + i, 0)

    kernel = _make_mse_kernel(tile_rows, steps, arr_rows, needs_mask)

    out_bytes = num_splits * ACC_ROWS * LANES * 4
    cost = pl.CostEstimate(
        flops=3 * n_elems,
        transcendentals=0,
        bytes_accessed=n_elems * (jnp.dtype(img.dtype).itemsize
                                  + jnp.dtype(content.dtype).itemsize) + out_bytes,
    )

    partials = pl.pallas_call(
        kernel,
        out_shape=jax.ShapeDtypeStruct((num_splits, ACC_ROWS, LANES), jnp.float32),
        grid_spec=pltpu.PrefetchScalarGridSpec(
            num_scalar_prefetch=0,
            grid=(num_splits, steps),
            in_specs=[
                pl.BlockSpec((tile_rows, LANES), in_map),
                pl.BlockSpec((tile_rows, LANES), in_map),
            ],
            # Resident, lane-dense accumulator block per parallel split.
            out_specs=pl.BlockSpec((None, ACC_ROWS, LANES), lambda s, i: (s, 0, 0)),
        ),
        compiler_params=pltpu.CompilerParams(
            dimension_semantics=("parallel", "arbitrary"),
            vmem_limit_bytes=vmem_limit,
        ),
        cost_estimate=cost,
    )(img2d, content2d)

    # Single cross-lane/cross-split reduce + 1/N scaling, outside the hot loop.
    loss = jnp.sum(partials) * jnp.float32(1.0 / n_elems)

    # Module returns img unchanged (identity pass-through); loss = self.loss.
    return img, loss


if __name__ == "__main__":
    key = jax.random.PRNGKey(0)
    k_img, k_content = jax.random.split(key)

    def ref_mse(a, b):
        return jnp.mean((a.astype(jnp.float32) - b.astype(jnp.float32)) ** 2)

    # 1) Small NCHW feature map, 128-divisible element count (zero-copy path).
    shape = (2, 4, 16, 16)
    img = jax.random.normal(k_img, shape, dtype=jnp.float32)
    content = jax.random.normal(k_content, shape, dtype=jnp.float32)
    out_img, loss = content_loss(img, content)
    jax.block_until_ready((out_img, loss))
    assert jnp.allclose(loss, ref_mse(img, content), rtol=1e-5, atol=1e-6)
    assert jnp.array_equal(out_img, img)

    # 2) Non-128-divisible element count (minimal zero-pad path).
    shape2 = (1, 3, 10, 7)
    img2 = jax.random.normal(k_img, shape2, dtype=jnp.float32)
    content2 = jax.random.normal(k_content, shape2, dtype=jnp.float32)
    _, loss2 = content_loss(img2, content2)
    jax.block_until_ready(loss2)
    assert jnp.allclose(loss2, ref_mse(img2, content2), rtol=1e-5, atol=1e-6)

    # 3) bf16 activations (stay bf16 on the wire, f32 accumulation in-kernel).
    shape3 = (2, 8, 16, 16)
    img3 = jax.random.normal(k_img, shape3, dtype=jnp.bfloat16)
    content3 = jax.random.normal(k_content, shape3, dtype=jnp.bfloat16)
    _, loss3 = content_loss(img3, content3)
    jax.block_until_ready(loss3)
    assert jnp.allclose(loss3, ref_mse(img3, content3), rtol=1e-5, atol=1e-6)

    # 4) rows not a multiple of the tile -> exercises in-kernel mask + clamp.
    shape4 = (2, 4, 25, 64)   # 12800 elems -> 100 lane rows, tile 96, 2 steps
    img4 = jax.random.normal(k_img, shape4, dtype=jnp.float32)
    content4 = jax.random.normal(k_content, shape4, dtype=jnp.float32)
    _, loss4 = content_loss(img4, content4)
    jax.block_until_ready(loss4)
    assert jnp.allclose(loss4, ref_mse(img4, content4), rtol=1e-5, atol=1e-6)

    # 5) Large-enough slab to take the 2-way split on 2-TC chips (v7x).
    shape5 = (2, 4, 32, 128)  # 32768 elems -> 256 lane rows
    img5 = jax.random.normal(k_img, shape5, dtype=jnp.float32)
    content5 = jax.random.normal(k_content, shape5, dtype=jnp.float32)
    _, loss5 = content_loss(img5, content5)
    jax.block_until_ready(loss5)
    assert jnp.allclose(loss5, ref_mse(img5, content5), rtol=1e-5, atol=1e-6)

    print("KERNEL_OK")
</pallas_src>

<mosaic_0001>
module attributes {stable_mosaic.version = 11 : i64} {
  func.func @kernel(%arg0: i32, %arg1: i32, %arg2: memref<32x128xf32, #tpu.memory_space<vmem>>, %arg3: memref<32x128xf32, #tpu.memory_space<vmem>>, %arg4: memref<1x32x128xf32, #tpu.memory_space<vmem>>) attributes {dimension_semantics = [#tpu.dimension_semantics<parallel>, #tpu.dimension_semantics<arbitrary>], iteration_bounds = array<i64: 1, 1>, scalar_prefetch = 0 : i64, scratch_operands = 0 : i64, tpu.core_type = #tpu.core_type<tc>, window_params = [{transform_indices = @transform_0, window_bounds = array<i64: 32, 128>}, {transform_indices = @transform_1, window_bounds = array<i64: 32, 128>}, {transform_indices = @transform_2, window_bounds = array<i64: 1, 32, 128>}]} {
    %c0_i32 = arith.constant 0 : i32
    %0 = arith.cmpi eq, %arg1, %c0_i32 : i32
    %1 = arith.extui %0 : i1 to i32
    %c0_i32_0 = arith.constant 0 : i32
    %2 = arith.cmpi ne, %1, %c0_i32_0 : i32
    scf.if %2 {
      %cst_10 = arith.constant 0.000000e+00 : f32
      %15 = vector.broadcast %cst_10 : f32 to vector<32x128xf32>
      %c0_11 = arith.constant 0 : index
      %c0_12 = arith.constant 0 : index
      %c0_13 = arith.constant 0 : index
      %16 = vector.load %arg4[%c0_11, %c0_12, %c0_13] : memref<1x32x128xf32, #tpu.memory_space<vmem>>, vector<1x32x128xf32>
      %17 = vector.shape_cast %16 : vector<1x32x128xf32> to vector<32x128xf32>
      %18 = vector.shape_cast %15 : vector<32x128xf32> to vector<1x32x128xf32>
      tpu.vector_store %arg4[%c0_11, %c0_12, %c0_13], %18 {strides = array<i32>} : memref<1x32x128xf32, #tpu.memory_space<vmem>>, vector<1x32x128xf32>,
    } else {
    }
    %c0 = arith.constant 0 : index
    %c0_1 = arith.constant 0 : index
    %3 = vector.load %arg2[%c0, %c0_1] : memref<32x128xf32, #tpu.memory_space<vmem>>, vector<32x128xf32>
    %c0_2 = arith.constant 0 : index
    %c0_3 = arith.constant 0 : index
    %4 = vector.load %arg3[%c0_2, %c0_3] : memref<32x128xf32, #tpu.memory_space<vmem>>, vector<32x128xf32>
    %5 = arith.subf %3, %4 : vector<32x128xf32>
    %6 = arith.mulf %5, %5 : vector<32x128xf32>
    %c0_4 = arith.constant 0 : index
    %c0_5 = arith.constant 0 : index
    %c0_6 = arith.constant 0 : index
    %7 = vector.load %arg4[%c0_4, %c0_5, %c0_6] : memref<1x32x128xf32, #tpu.memory_space<vmem>>, vector<1x32x128xf32>
    %8 = vector.shape_cast %7 : vector<1x32x128xf32> to vector<32x128xf32>
    %9 = vector.shape_cast %6 : vector<32x128xf32> to vector<1x32x128xf32>
    %cst = arith.constant dense<0.000000e+00> : vector<32x128xf32>
    %10 = vector.multi_reduction <add>, %9, %cst [0] : vector<1x32x128xf32> to vector<32x128xf32>
    %11 = arith.addf %8, %10 : vector<32x128xf32>
    %c0_7 = arith.constant 0 : index
    %c0_8 = arith.constant 0 : index
    %c0_9 = arith.constant 0 : index
    %12 = vector.load %arg4[%c0_7, %c0_8, %c0_9] : memref<1x32x128xf32, #tpu.memory_space<vmem>>, vector<1x32x128xf32>
    %13 = vector.shape_cast %12 : vector<1x32x128xf32> to vector<32x128xf32>
    %14 = vector.shape_cast %11 : vector<32x128xf32> to vector<1x32x128xf32>
    tpu.vector_store %arg4[%c0_7, %c0_8, %c0_9], %14 {strides = array<i32>} : memref<1x32x128xf32, #tpu.memory_space<vmem>>, vector<1x32x128xf32>,
    return
  }
  func.func @transform_0(%arg0: i32, %arg1: i32) -> (i32, i32) {
    %c1_i32 = arith.constant 1 : i32
    %0 = arith.muli %arg0, %c1_i32 : i32
    %1 = arith.addi %0, %arg1 : i32
    %c0_i32 = arith.constant 0 : i32
    %c0_i32_0 = arith.constant 0 : i32
    return %1, %c0_i32 : i32, i32
  }
  func.func @transform_1(%arg0: i32, %arg1: i32) -> (i32, i32) {
    %c1_i32 = arith.constant 1 : i32
    %0 = arith.muli %arg0, %c1_i32 : i32
    %1 = arith.addi %0, %arg1 : i32
    %c0_i32 = arith.constant 0 : i32
    %c0_i32_0 = arith.constant 0 : i32
    return %1, %c0_i32 : i32, i32
  }
  func.func @transform_2(%arg0: i32, %arg1: i32) -> (i32, i32, i32) {
    %c0_i32 = arith.constant 0 : i32
    %c0_i32_0 = arith.constant 0 : i32
    %c0_i32_1 = arith.constant 0 : i32
    return %arg0, %c0_i32, %c0_i32_0 : i32, i32, i32
  }
}

</mosaic_0001>

<bundles_post_ra>
// kernel: tpu_custom_call.1
= control target key start
LH: loop header
LB: loop body
LE: loop exit
PB: predicated region body
PF: predicated region fallthrough
CT: control target
= control target key end

     0   :  { %7 = vsyncpa [#allocation3], 0  ;;  %s238_s0 = inlined_call_operand.hbm [shape: f32[32,128], index: 0, kind: input, shape index: {}]   ;;  %s239_s1 = inlined_call_operand.hbm [shape: f32[32,128], index: 1, kind: input, shape index: {}]   ;;  %s240_s2 = inlined_call_operand.hbm [shape: f32[1,32,128], index: 2, kind: output, shape index: {}]  }
   0x1   :  { %8 = vsyncpa [#allocation6], 0 }
   0x2   :  { %9 = vsyncpa [#allocation4], 0  ;;  %s18_s11 = sshll.u32 %s238_s0, 4  ;;  %s200_s12 = smov [#allocation2]   ;;  %s19_s11 = int_to_ptr.hbm [resolvable:$true] %s18_s11 }
   0x3   :  { %s20_s13 = sshll.u32 %s200_s12, 4  ;;  %s35_s16 = sshll.u32 %s239_s1, 4  ;;  %s21_s13 = int_to_ptr.vmem [resolvable:$true] %s20_s13  ;;  %s36_s16 = int_to_ptr.hbm [resolvable:$true] %s35_s16 }
   0x4   :  { %s201_s17 = smov 128   ;;  %s202_s18 = smov 8  }
   0x5   :  { %26 = dma.hbm_to_vmem [thread:$0]  %s19_s11, 512, %s21_s13, [#allocation3], %s201_s17, %s201_s17, %s202_s18  }
   0x6   :  { %s203_s19 = smov [#allocation5]  }
   0x7   :  { %s37_s20 = sshll.u32 %s203_s19, 4  ;;  %s38_s20 = int_to_ptr.vmem [resolvable:$true] %s37_s20 }
   0x8   :  { %43 = dma.hbm_to_vmem [thread:$0]  %s36_s16, 512, %s38_s20, [#allocation6], %s201_s17, %s201_s17, %s202_s18  }
   0x9   :  { %194 = dma.done.wait [#allocation3], 512  }
   0xa   :  { %195 = vsyncadd [#allocation3], 4294966784 }
   0xb   :  { %196 = dma.done.wait [#allocation6], 512  }
   0xc   :  { %197 = vsyncadd [#allocation6], 4294966784  ;;  %v64_v0 = vld [vmem:[#allocation2] sm:$0xff]  ;;  %v65_v2 = vld [vmem:[#allocation2 + $0x8] sm:$0xff]  ;;  %s204_s0 = smov [#allocation7]   ;;  %s102_s23 = sshll.u32 %s240_s2, 4  ;;  %s103_s23 = int_to_ptr.hbm [resolvable:$true] %s102_s23 }
   0xd   :  { %v68_v1 = vld [vmem:[#allocation5] sm:$0xff]  ;;  %v69_v4 = vld [vmem:[#allocation5 + $0x8] sm:$0xff]  ;;  %v66_v5 = vld [vmem:[#allocation2 + $0x10] sm:$0xff]  ;;  %s100_s1 = sshll.u32 %s204_s0, 4  ;;  %s101_s1 = int_to_ptr.vmem [resolvable:$true] %s100_s1 }
   0xe   :  { %v72_v3 = vsub.f32 %v64_v0, %v68_v1  ;;  %v70_v6 = vld [vmem:[#allocation5 + $0x10] sm:$0xff]  ;;  %v73_v7 = vsub.f32 %v65_v2, %v69_v4  ;;  %v67_v9 = vld [vmem:[#allocation2 + $0x18] sm:$0xff] }
   0xf   :  { %v74_v8 = vsub.f32 %v66_v5, %v70_v6  ;;  %v71_v10 = vld [vmem:[#allocation5 + $0x18] sm:$0xff] }
  0x10   :  { %v76_v11 = vmul.f32 %v72_v3, %v72_v3  ;;  %v75_v12 = vsub.f32 %v67_v9, %v71_v10  ;;  %v77_v13 = vmul.f32 %v73_v7, %v73_v7 }
  0x11   :  { %v78_v14 = vmul.f32 %v74_v8, %v74_v8 }
  0x12   :  { %v79_v15 = vmul.f32 %v75_v12, %v75_v12  ;;  %92 = vst [vmem:[#allocation7] sm:$0xff] %v76_v11 }
  0x13   :  { %93 = vst [vmem:[#allocation7 + $0x8] sm:$0xff] %v77_v13 }
  0x14   :  { %94 = vst [vmem:[#allocation7 + $0x10] sm:$0xff] %v78_v14 }
  0x15   :  { %95 = vst [vmem:[#allocation7 + $0x18] sm:$0xff] %v79_v15 }
  0x16   :  { %108 = dma.vmem_to_hbm [thread:$0]  %s101_s1, 512, %s103_s23, [#allocation4], %s201_s17, %s201_s17, %s202_s18  }
  0x17   :  { %198 = dma.done.wait [#allocation4], 512  }
  0x18   :  { %199 = vsyncadd [#allocation4], 4294966784 }
  0x19   :  { %113 = vsyncpa [#allocation3], 1 }
  0x1a   :  { %114 = vsyncpa [#allocation6], 1 }
  0x1b   :  { %115 = vsyncpa [#allocation4], 1 }

</bundles_post_ra>
